<compile_context>
chip_gen: v6e
topology: v6e:2x2x1
jax: 0.10.0
libtpu: 0.0.40
codegen_flags: <defaults>
</compile_context>

<pallas_src>
import jax
import jax.numpy as jnp
from jax.experimental import pallas as pl
from jax.experimental.pallas import tpu as pltpu


def _round_up(x, m):
    return ((x + m - 1) // m) * m


def _tf_embed_kernel(x_ref, w_ref, o_ref):
    """(TILE, Kp) @ (Kp, Np) on the MXU; precision=HIGHEST keeps ~f32 accuracy."""
    o_ref[...] = jnp.dot(
        x_ref[...],
        w_ref[...],
        preferred_element_type=jnp.float32,
        precision=jax.lax.Precision.HIGHEST,
    ).astype(o_ref.dtype)


def _block_diag_weight(w_t, pack):
    """(K, N) -> (pack*K, pack*N) with w_t repeated along the block diagonal."""
    K, N = w_t.shape
    eye = jnp.eye(pack, dtype=w_t.dtype)
    return (eye[:, None, :, None] * w_t[None, :, None, :]).reshape(pack * K, pack * N)


def time_feature_embedding(x, weight, *, tile_rows=8192, out_dtype=None):
    """x: (B, L, d_inp); weight: (d_model, d_inp) (PyTorch nn.Linear layout, no bias).

    Returns (B, L, d_model) = x @ weight.T computed by a Pallas TPU kernel.
    out_dtype: output dtype (default x.dtype); jnp.bfloat16 halves HBM write traffic.
    """
    B, L, d_inp = x.shape
    d_model = weight.shape[0]
    out_dtype = jnp.dtype(x.dtype if out_dtype is None else out_dtype)
    M = B * L
    w_t = weight.T.astype(x.dtype)                       # (K, N)

    # Lane-dense packing: fold `pack` rows so the output last dim is 128.
    pack = 128 // d_model if (d_model <= 128 and 128 % d_model == 0) else 1

    # Zero-pad M up to a multiple of `pack`; a few padded rows is far cheaper
    # than losing lane-dense stores for the whole kernel.
    M_pad = _round_up(M, pack)
    x_flat = x.reshape(M, d_inp)
    if M_pad != M:
        x_flat = jnp.pad(x_flat, ((0, M_pad - M), (0, 0)))

    Kp, Np, Mp = pack * d_inp, pack * d_model, M_pad // pack
    x2d = x_flat.reshape(Mp, Kp)
    w_k = _block_diag_weight(w_t, pack) if pack > 1 else w_t

    # --- Tile sizing (VMEM budget counts the lane-padding of the x block) ----
    # A (tile_m, Kp) f32 block is padded to 128 lanes in VMEM, so per packed row:
    #   x block   : round_up(Kp,128) * 4 B   (== 512 B, same as the output block)
    #   out block : round_up(Np,128) * itemsize
    # both double-buffered by the Pallas pipeline.
    x_row_bytes = _round_up(Kp, 128) * jnp.dtype(x.dtype).itemsize
    o_row_bytes = _round_up(Np, 128) * out_dtype.itemsize
    bytes_per_row_2buf = 2 * (x_row_bytes + o_row_bytes)
    vmem_budget = 40 << 20                               # headroom vs v7x's 64 MiB physical
    max_tile_vmem = max(8, (vmem_budget // bytes_per_row_2buf) // 8 * 8)

    tile_m = max(8, (min(tile_rows, max_tile_vmem) // 8) * 8)
    # Guarantee >=2 grid steps when possible so dimension_semantics=("parallel",)
    # can feed both v7x TensorCores (no-op on single-TC v5e/v6e).
    tile_m = min(tile_m, _round_up(pl.cdiv(Mp, 2), 8))
    grid = (pl.cdiv(Mp, tile_m),)

    w_blk_bytes = _round_up(Kp, 8) * _round_up(Np, 128) * jnp.dtype(w_k.dtype).itemsize
    vmem_need = tile_m * bytes_per_row_2buf + 2 * w_blk_bytes
    vmem_limit = int(min(max(vmem_need + (4 << 20), 16 << 20), 64 << 20))

    cost = pl.CostEstimate(
        flops=2 * M_pad * d_inp * d_model,
        transcendentals=0,
        bytes_accessed=(x2d.size * jnp.dtype(x.dtype).itemsize
                        + w_k.size * jnp.dtype(w_k.dtype).itemsize
                        + Mp * Np * out_dtype.itemsize),
    )

    out = pl.pallas_call(
        _tf_embed_kernel,
        out_shape=jax.ShapeDtypeStruct((Mp, Np), out_dtype),
        grid=grid,
        in_specs=[
            pl.BlockSpec((tile_m, Kp), lambda i: (i, 0)),   # streamed row tiles
            pl.BlockSpec((Kp, Np), lambda i: (0, 0)),       # weight stays VMEM-resident
        ],
        out_specs=pl.BlockSpec((tile_m, Np), lambda i: (i, 0)),
        compiler_params=pltpu.CompilerParams(
            dimension_semantics=("parallel",),
            vmem_limit_bytes=vmem_limit,
        ),
        cost_estimate=cost,
    )(x2d, w_k)

    out = out.reshape(M_pad, d_model)
    if M_pad != M:
        out = out[:M]
    return out.reshape(B, L, d_model)


def _reference(x, weight):
    # Exact-f32 reference (broadcast multiply + sum; no MXU precision ambiguity).
    return jnp.sum(x[..., :, None] * weight.T[None, None, :, :], axis=-2)


if __name__ == "__main__":
    # Module config: d_model=32, embed_type='timeF', freq='h' -> d_inp=4, no bias.
    d_model = 32
    d_inp = 4  # freq_map['h']
    B, L = 2, 8

    key = jax.random.PRNGKey(0)
    k_x, k_w = jax.random.split(key)

    x = jax.random.normal(k_x, (B, L, d_inp), dtype=jnp.float32)
    # Deterministic init mimicking nn.Linear's uniform(-1/sqrt(fan_in), 1/sqrt(fan_in)).
    bound = 1.0 / (d_inp ** 0.5)
    weight = jax.random.uniform(
        k_w, (d_model, d_inp), dtype=jnp.float32, minval=-bound, maxval=bound
    )

    y = jax.block_until_ready(time_feature_embedding(x, weight))
    y_ref = _reference(x, weight)
    assert y.shape == (B, L, d_model)
    assert jnp.allclose(y, y_ref, atol=1e-4, rtol=1e-4)

    # Multi-step grid / partial-final-block path (Mp=250 packed rows, grid=4).
    B2, L2 = 4, 250
    x2 = jax.random.normal(jax.random.PRNGKey(1), (B2, L2, d_inp), dtype=jnp.float32)
    y2 = jax.block_until_ready(time_feature_embedding(x2, weight, tile_rows=64))
    assert jnp.allclose(y2, _reference(x2, weight), atol=1e-4, rtol=1e-4)

    # Row-padding path (M=7 not a multiple of pack=4 -> padded to 8, sliced back).
    x3 = jax.random.normal(jax.random.PRNGKey(2), (1, 7, d_inp), dtype=jnp.float32)
    y3 = jax.block_until_ready(time_feature_embedding(x3, weight))
    assert y3.shape == (1, 7, d_model)
    assert jnp.allclose(y3, _reference(x3, weight), atol=1e-4, rtol=1e-4)

    # bf16-output option (halves the dominant HBM write traffic on this mem-bound kernel).
    y4 = jax.block_until_ready(
        time_feature_embedding(x2, weight, out_dtype=jnp.bfloat16)
    )
    assert y4.dtype == jnp.bfloat16
    assert jnp.allclose(y4.astype(jnp.float32), _reference(x2, weight), atol=2e-2, rtol=2e-2)

    print("KERNEL_OK")
</pallas_src>

<mosaic_0001>
module attributes {stable_mosaic.version = 11 : i64} {
  func.func @_tf_embed_kernel(%arg0: i32, %arg1: memref<8x16xf32, #tpu.memory_space<vmem>>, %arg2: memref<16x128xf32, #tpu.memory_space<vmem>>, %arg3: memref<8x128xf32, #tpu.memory_space<vmem>>) attributes {dimension_semantics = [#tpu.dimension_semantics<parallel>], iteration_bounds = array<i64: 1>, scalar_prefetch = 0 : i64, scratch_operands = 0 : i64, tpu.core_type = #tpu.core_type<tc>, window_params = [{transform_indices = @transform_0, window_bounds = array<i64: 8, 16>}, {pipeline_mode = #tpu.pipeline_mode<synchronous>, transform_indices = @transform_1, window_bounds = array<i64: 16, 128>}, {transform_indices = @transform_2, window_bounds = array<i64: 8, 128>}]} {
    %c0 = arith.constant 0 : index
    %c0_0 = arith.constant 0 : index
    %0 = vector.load %arg1[%c0, %c0_0] : memref<8x16xf32, #tpu.memory_space<vmem>>, vector<8x16xf32>
    %c0_1 = arith.constant 0 : index
    %c0_2 = arith.constant 0 : index
    %1 = vector.load %arg2[%c0_1, %c0_2] : memref<16x128xf32, #tpu.memory_space<vmem>>, vector<16x128xf32>
    %cst = arith.constant dense<0.000000e+00> : vector<8x128xf32>
    %2 = tpu.matmul %0, %1, %cst {dimension_numbers = #tpu.dot_dimension_numbers<[1], [0], [0], [1], [0, 0, 1, 1], [], []>, precision = #tpu.contract_precision<fp32>} : vector<8x16xf32>, vector<16x128xf32>, vector<8x128xf32> -> vector<8x128xf32>
    %c0_3 = arith.constant 0 : index
    %c0_4 = arith.constant 0 : index
    %3 = vector.load %arg3[%c0_3, %c0_4] : memref<8x128xf32, #tpu.memory_space<vmem>>, vector<8x128xf32>
    tpu.vector_store %arg3[%c0_3, %c0_4], %2 {strides = array<i32>} : memref<8x128xf32, #tpu.memory_space<vmem>>, vector<8x128xf32>,
    return
  }
  func.func @transform_0(%arg0: i32) -> (i32, i32) {
    %c0_i32 = arith.constant 0 : i32
    %c0_i32_0 = arith.constant 0 : i32
    return %arg0, %c0_i32 : i32, i32
  }
  func.func @transform_1(%arg0: i32) -> (i32, i32) {
    %c0_i32 = arith.constant 0 : i32
    %c0_i32_0 = arith.constant 0 : i32
    %c0_i32_1 = arith.constant 0 : i32
    return %c0_i32, %c0_i32_0 : i32, i32
  }
  func.func @transform_2(%arg0: i32) -> (i32, i32) {
    %c0_i32 = arith.constant 0 : i32
    %c0_i32_0 = arith.constant 0 : i32
    return %arg0, %c0_i32 : i32, i32
  }
}

</mosaic_0001>

<bundles_post_ra>
// kernel: tpu_custom_call.1
= control target key start
LH: loop header
LB: loop body
LE: loop exit
PB: predicated region body
PF: predicated region fallthrough
CT: control target
= control target key end

     0   :  { %7 = vsyncpa [#allocation3], 0  ;;  %s705_s0 = inlined_call_operand.hbm [shape: f32[4,16], index: 0, kind: input, shape index: {}]   ;;  %s706_s1 = inlined_call_operand.hbm [shape: f32[16,128], index: 1, kind: input, shape index: {}]   ;;  %s707_s2 = inlined_call_operand.hbm [shape: f32[4,128], index: 2, kind: output, shape index: {}]  }
   0x1   :  { %8 = vsyncpa [#allocation6], 0 }
   0x2   :  { %9 = vsyncpa [#allocation4], 0 }
   0x3   :  { %14 = vsyncadd [#allocation3], 64  ;;  %s660_s9 = smov [#allocation2]  }
   0x4   :  { %s15_s10 = sshll.u32 %s660_s9, 4  ;;  %s16_s10 = int_to_ptr.vmem [resolvable:$true] %s15_s10 }
   0x5   :  { %s602_s11 = scalar_lea.vmem %s16_s10, 64  ;;  %s606_s12 = scalar_lea.vmem %s16_s10, 128 }
   0x6   :  { %p603_p0 = scmp.ne.s32.totalorder %s16_s10, %s602_s11  ;;  %p607_p1 = scmp.lt.s32.totalorder %s16_s10, %s16_s10 }
   0x7   :  { %p608_p2 = scmp.lt.s32.totalorder %s606_s12, %s602_s11 }
   0x9   :  { %p609_p3 = por %p608_p2, %p607_p1 }
   0xb   :  { %p610_p4 = pnand %p609_p3, %p603_p0 }
   0xd   :  { %613 = shalt.err (!%p610_p4)
}
   0xe   :  { %s661_s13 = smov 64   ;;  %s662_s14 = smov 4  }
   0xf   :  { %21 = dma.hbm_to_vmem [thread:$0]  %s705_s0, 64, %s16_s10, [#allocation3], %s661_s13, %s661_s13, %s662_s14  }
  0x10   :  { %s663_s17 = smov [#allocation5]  }
  0x11   :  { %s27_s18 = sshll.u32 %s663_s17, 4  ;;  %s28_s18 = int_to_ptr.vmem [resolvable:$true] %s27_s18 }
  0x12   :  { %s622_s19 = scalar_lea.vmem %s28_s18, 256  ;;  %p627_p6 = scmp.lt.s32.totalorder %s28_s18, %s28_s18 }
  0x13   :  { %p623_p5 = scmp.ne.s32.totalorder %s28_s18, %s622_s19  ;;  %p628_p7 = scmp.lt.s32.totalorder %s622_s19, %s622_s19 }
  0x15   :  { %p629_p8 = por %p628_p7, %p627_p6 }
  0x17   :  { %p630_p9 = pnand %p629_p8, %p623_p5 }
  0x19   :  { %633 = shalt.err (!%p630_p9)
}
  0x1a   :  { %s664_s20 = smov 128   ;;  %s665_s21 = smov 8  }
  0x1b   :  { %33 = dma.hbm_to_vmem [thread:$0]  %s706_s1, 256, %s28_s18, [#allocation6], %s664_s20, %s664_s20, %s665_s21  }
  0x1c   :  { %654 = dma.done.wait [#allocation3], 128  }
  0x1d   :  { %655 = vsyncadd [#allocation3], 4294967168 }
  0x1e   :  { %656 = dma.done.wait [#allocation6], 256  }
  0x1f   :  { %657 = vsyncadd [#allocation6], 4294967040  ;;  %v666_v0 = vmov 0.0   ;;  %vm667_vm0 = vmmov 0   ;;  %vm43_vm1 = vcmask 130048   ;;  %v42_v1 = vld [vmem:[#allocation5 + $0x8] sm:$0xff] }
  0x20   :  { %543 = vmatprep.subr.mxu0 %v666_v0  ;;  %550 = vmatprep.subr.mxu1 %v666_v0  ;;  %v41_v2 = vld [vmem:[#allocation5] sm:$0xff]  ;;  %v40_v3 = vld [vmem:[#allocation2] sm:$0xff]  ;;  %v76_v4 = vand.u32 4294901760, %v42_v1 }
  0x21   :  { %547 = vmatprep.mubr.msk.f32.mxu0 %vm667_vm0, %v666_v0  ;;  %554 = vmatprep.mubr.msk.f32.mxu1 %vm667_vm0, %v666_v0  ;;  %v79_v5 = vand.u32 4294901760, %v41_v2  ;;  %v45_v6 = vsel %vm43_vm1, %v40_v3, 0 }
  0x22   :  { %v114_v7 = vand.u32 4294901760, %v45_v6  ;;  %544 = vmatpush3.msra.mxu0 %v76_v4  ;;  %v154_v8 = vsub.f32 %v42_v1, %v76_v4 }
  0x23   :  { %v161_v9 = vsub.f32 %v41_v2, %v79_v5  ;;  %545 = vmatprep.subr.mxu0 %v666_v0 }
  0x24   :  { %v115_v10 = vsub.f32 %v45_v6, %v114_v7  ;;  %546 = vmatpush3.msra.mxu0 %v79_v5  ;;  %v155_v11 = vand.u32 4294901760, %v154_v8 }
  0x25   :  { %v162_v12 = vand.u32 4294901760, %v161_v9  ;;  %557 = vmatprep.subr.mxu0 %v666_v0 }
  0x26   :  { %v116_v13 = vand.u32 4294901760, %v115_v10  ;;  %v156_v14 = vsub.f32 %v154_v8, %v155_v11 }
  0x27   :  { %v163_v15 = vsub.f32 %v161_v9, %v162_v12 }
  0x28   :  { %v117_v16 = vsub.f32 %v115_v10, %v116_v13  ;;  %v157_v17 = vand.u32 4294901760, %v156_v14 }
  0x29   :  { %v164_v18 = vand.u32 4294901760, %v163_v15 }
  0x2a   :  { %v118_v19 = vand.u32 4294901760, %v117_v16  ;;  %551 = vmatpush3.msra.mxu1 %v157_v17 }
  0x2b   :  { %552 = vmatprep.subr.mxu1 %v666_v0 }
  0x2c   :  { %548 = vmatmul.mubr.f32.vlgmr.msra.gmra.mxu0 %v118_v19  ;;  %553 = vmatpush3.msra.mxu1 %v164_v18 }
  0x2d   :  { %558 = vmatpush3.msra.mxu0 %v154_v8  ;;  %555 = vmatmul.mubr.f32.vlgmr.msra.gmra.mxu1 %v114_v7 }
  0x2e   :  { %559 = vmatprep.subr.mxu0 %v666_v0  ;;  %564 = vmatprep.subr.mxu1 %v666_v0 }
  0x2f   :  { %560 = vmatpush3.msra.mxu0 %v161_v9  ;;  %561 = vmatprep.mubr.msk.f32.mxu0 %vm667_vm0, %v666_v0 }
  0x30   :  { %565 = vmatpush3.msra.mxu1 %v76_v4  ;;  %562 = vmatmul.mubr.f32.vlgmr.msra.gmra.mxu0 %v115_v10 }
  0x31   :  { %566 = vmatprep.subr.mxu1 %v666_v0  ;;  %571 = vmatprep.subr.mxu0 %v666_v0 }
  0x32   :  { %567 = vmatpush3.msra.mxu1 %v79_v5  ;;  %568 = vmatprep.mubr.msk.f32.mxu1 %vm667_vm0, %v666_v0 }
  0x33   :  { %572 = vmatpush3.msra.mxu0 %v155_v11  ;;  %569 = vmatmul.mubr.f32.vlgmr.msra.gmra.mxu1 %v116_v13 }
  0x34   :  { %573 = vmatprep.subr.mxu0 %v666_v0  ;;  %578 = vmatprep.subr.mxu1 %v666_v0 }
  0x35   :  { %574 = vmatpush3.msra.mxu0 %v162_v12  ;;  %575 = vmatprep.mubr.msk.f32.mxu0 %vm667_vm0, %v666_v0 }
  0x36   :  { %579 = vmatpush3.msra.mxu1 %v76_v4  ;;  %576 = vmatmul.mubr.f32.vlgmr.msra.gmra.mxu0 %v114_v7 }
  0x37   :  { %580 = vmatprep.subr.mxu1 %v666_v0  ;;  %582 = vmatprep.mubr.msk.f32.mxu1 %vm667_vm0, %v666_v0 }
  0x38   :  { %581 = vmatpush3.msra.mxu1 %v79_v5 }
  0x39   :  { %583 = vmatmul.mubr.f32.vlgmr.msra.gmra.mxu1 %v114_v7 }
  0xec   :  { %v120_v20 = vpop.f32.mrf.mxu0 }
  0xed   :  { %v201_v22 = vpop.f32.mrf.mxu1 }
  0xee   :  { %v549_v21 = vpop.f32.mrf.mxu0  ;;  %v202_v23 = vadd.f32 %v201_v22, %v120_v20 }
  0xef   :  { %v556_v24 = vpop.f32.mrf.mxu1 }
  0xf0   :  { %v277_v25 = vpop.f32.mrf.mxu0 }
  0xf1   :  { %v278_v26 = vadd.f32 %v277_v25, %v202_v23 }
  0xf2   :  { %v563_v27 = vpop.f32.mrf.mxu0 }
  0xf3   :  { %v352_v28 = vpop.f32.mrf.mxu1 }
  0xf4   :  { %v353_v29 = vadd.f32 %v352_v28, %v278_v26 }
  0xf5   :  { %v570_v30 = vpop.f32.mrf.mxu1 }
  0xf6   :  { %v429_v31 = vpop.f32.mrf.mxu0 }
  0xf7   :  { %v430_v32 = vadd.f32 %v429_v31, %v353_v29 }
  0xf8   :  { %v577_v33 = vpop.f32.mrf.mxu0 }
  0xf9   :  { %v502_v34 = vpop.f32.mrf.mxu1 }
  0xfa   :  { %v503_v35 = vadd.f32 %v502_v34, %v430_v32 }
  0xfb   :  { %v584_v36 = vpop.f32.mrf.mxu1 }
  0xfc   :  { %506 = vst [vmem:[#allocation7] sm:$0xff] %v503_v35 }
  0xfd   :  { %511 = vsyncadd [#allocation4], 64  ;;  %s668_s0 = smov [#allocation7]  }
  0xfe   :  { %s512_s1 = sshll.u32 %s668_s0, 4  ;;  %s513_s1 = int_to_ptr.vmem [resolvable:$true] %s512_s1 }
  0xff   :  { %s634_s24 = scalar_lea.vmem %s513_s1, 64  ;;  %s638_s25 = scalar_lea.vmem %s513_s1, 128 }
 0x100   :  { %p635_p10 = scmp.ne.s32.totalorder %s513_s1, %s634_s24  ;;  %p639_p11 = scmp.lt.s32.totalorder %s513_s1, %s513_s1 }
 0x101   :  { %p640_p12 = scmp.lt.s32.totalorder %s638_s25, %s634_s24 }
 0x103   :  { %p641_p13 = por %p640_p12, %p639_p11 }
 0x105   :  { %p642_p0 = pnand %p641_p13, %p635_p10 }
 0x107   :  { %645 = shalt.err (!%p642_p0)
}
 0x108   :  { %518 = dma.vmem_to_hbm [thread:$0]  %s513_s1, 64, %s707_s2, [#allocation4], %s661_s13, %s661_s13, %s662_s14  }
 0x109   :  { %658 = dma.done.wait [#allocation4], 128  }
 0x10a   :  { %659 = vsyncadd [#allocation4], 4294967168 }
 0x10b   :  { %522 = vsyncpa [#allocation3], 1 }
 0x10c   :  { %523 = vsyncpa [#allocation6], 1 }
 0x10d   :  { %524 = vsyncpa [#allocation4], 1 }

</bundles_post_ra>
